<compile_context>
chip_gen: v6e
topology: v6e:2x2x1
jax: 0.10.0
libtpu: 0.0.40
codegen_flags: <defaults>
</compile_context>

<pallas_src>
import jax
import jax.numpy as jnp
from jax import lax
from jax.experimental import pallas as pl
from jax.experimental.pallas import tpu as pltpu


def attention_kernel(x_ref, w_ref, bv_ref, o_ref):
    # x_ref:  (TB*S, F)    -- TB batch elements, rows flattened batch-major (true F, no pad)
    # w_ref:  (F, A)       -- W.weight^T at true A (bf16)
    # bv_ref: (2, A)       -- row 0 = W.bias, row 1 = V.weight[0]  (f32)
    # o_ref:  (TB, F_OUT)  -- F_OUT = round_up(F, 128): lane-dense output slab
    tb, f_out = o_ref.shape
    rows, feat = x_ref.shape            # rows = TB*S (static), feat = F (static)
    seq = rows // tb                    # S (static python int)

    x_bf = x_ref[...].astype(jnp.bfloat16)             # bf16 MXU operand, cast in-register
    w_bf = w_ref[...].astype(jnp.bfloat16)
    bv = bv_ref[...].astype(jnp.float32)
    bias = bv[0:1, :]                                   # (1, A) f32
    v = bv[1:2, :]                                      # (1, A) f32

    # h = tanh(x @ W^T + b): one bf16 MXU matmul with f32 accumulation, tanh in f32 (EUP).
    h = jnp.tanh(jnp.dot(x_bf, w_bf, preferred_element_type=jnp.float32) + bias)  # (TB*S, A)

    # scores[b, r] = <v, h[r]> (identical for every b), computed directly in the (TB, TB*S)
    # layout needed below so no reshape/transpose of the score vector is ever required.
    v_b = jnp.broadcast_to(v.astype(jnp.bfloat16), (tb, v.shape[1]))              # (TB, A)
    scores = lax.dot_general(v_b, h.astype(jnp.bfloat16),
                             dimension_numbers=(((1,), (1,)), ((), ())),
                             preferred_element_type=jnp.float32)                  # (TB, TB*S)

    # Block-diagonal segment mask: output row b owns flattened columns [b*S, (b+1)*S).
    col = lax.broadcasted_iota(jnp.int32, (tb, rows), 1)
    row = lax.broadcasted_iota(jnp.int32, (tb, rows), 0)
    in_seg = (col >= row * seq) & (col < (row + 1) * seq)

    # Per-batch numerically-stable softmax over its own S columns (f32 elementwise).
    e = jnp.where(in_seg, scores, jnp.float32(-1e30))
    m = jnp.max(e, axis=-1, keepdims=True)
    p = jnp.exp(e - m)                                  # exactly 0 outside the segment
    z = jnp.sum(p, axis=-1, keepdims=True)
    attn = p * pl.reciprocal(z, approx=True)            # (TB, TB*S)

    # Weighted sum over the sequence as a single bf16 MXU contraction -> (TB, F) f32.
    out = jnp.dot(attn.astype(jnp.bfloat16), x_bf, preferred_element_type=jnp.float32)

    # Pad to 128 lanes in-register only, so the store below is a full unmasked vst.
    if feat < f_out:
        out = jnp.concatenate(
            [out, jnp.zeros((tb, f_out - feat), dtype=out.dtype)], axis=1)
    o_ref[...] = out.astype(o_ref.dtype)


def _round_up(n, m):
    return ((n + m - 1) // m) * m


def attention_forward(x, W_weight, W_bias, V_weight, *, batch_tile=8):
    """x: (B, S, F); W_weight: (A, F); W_bias: (A,); V_weight: (1, A)  ->  (B, F)."""
    B, S, F = x.shape
    A = W_weight.shape[0]

    tb = max(1, min(batch_tile, B))
    # The (TB*S, F) block's second-to-last dim must be divisible by 8 (or be the full dim).
    if (tb * S) % 8 != 0:
        tb = B                       # fall back to a single full-batch tile (always legal)
    b_pad = _round_up(B, tb)
    f_out = _round_up(F, 128)        # lane-dense output slab width (output only, NOT x)

    # x is passed at its TRUE feature width -- no HBM-side F padding / re-read.  The reshape
    # (B,S,F)->(B*S,F) of a contiguous array is free.  Batch is padded only if B % tb != 0;
    # those zero rows yield zero outputs and are sliced off below.
    if b_pad != B:
        x = jnp.pad(x, ((0, b_pad - B), (0, 0), (0, 0)))
    x2d = x.reshape(b_pad * S, F)

    w_t = W_weight.T.astype(jnp.bfloat16)                       # (F, A), bf16 MXU operand
    bv = jnp.stack([W_bias, V_weight[0]]).astype(jnp.float32)   # (2, A): bias row + V row

    grid = (b_pad // tb,)
    out = pl.pallas_call(
        attention_kernel,
        out_shape=jax.ShapeDtypeStruct((b_pad, f_out), x.dtype),
        grid_spec=pltpu.PrefetchScalarGridSpec(
            num_scalar_prefetch=0,
            grid=grid,
            in_specs=[
                pl.BlockSpec((tb * S, F), lambda i: (i, 0)),   # x tile (TB batches, true F)
                pl.BlockSpec((F, A), lambda i: (0, 0)),        # W^T (tiny, DMA'd once)
                pl.BlockSpec((2, A), lambda i: (0, 0)),        # merged bias / V rows
            ],
            out_specs=pl.BlockSpec((tb, f_out), lambda i: (i, 0)),
        ),
        compiler_params=pltpu.CompilerParams(
            dimension_semantics=("parallel",),   # >= 2 steps here -> shards across v7x's 2 TCs
        ),
    )(x2d, w_t, bv)
    return out[:B, :F]


def attention_ref(x, W_weight, W_bias, V_weight):
    # Pure-JAX f32 reference mirroring the PyTorch forward exactly.
    e = jnp.tanh(x @ W_weight.T + W_bias) @ V_weight.T   # (B, S, 1)
    attn = jax.nn.softmax(e[..., 0], axis=1)             # (B, S)
    return jnp.sum(x * attn[..., None], axis=1)          # (B, F)


if __name__ == "__main__":
    # Module hyperparameters: feature_size = F, attn_size = A.
    B, S, F, A = 16, 16, 32, 16

    key = jax.random.PRNGKey(0)
    kx, kw, kb, kv = jax.random.split(key, 4)

    x = jax.random.normal(kx, (B, S, F), dtype=jnp.float32)
    # nn.Linear parameter shapes: W.weight (A, F), W.bias (A,), V.weight (1, A) (no bias).
    W_weight = jax.random.normal(kw, (A, F), dtype=jnp.float32) * 0.1
    W_bias = jax.random.normal(kb, (A,), dtype=jnp.float32) * 0.1
    V_weight = jax.random.normal(kv, (1, A), dtype=jnp.float32) * 0.1

    out = attention_forward(x, W_weight, W_bias, V_weight)
    out = jax.block_until_ready(out)

    ref = attention_ref(x, W_weight, W_bias, V_weight)
    assert out.shape == (B, F)
    # The kernel intentionally uses bf16 MXU operands (per perf guidance) + an approx
    # reciprocal, so compare against the f32 reference at bf16-level tolerance.
    assert jnp.allclose(out, ref, atol=2e-2, rtol=2e-2), "mismatch vs reference"

    print("KERNEL_OK")
</pallas_src>

<mosaic_0001>
module attributes {stable_mosaic.version = 11 : i64} {
  func.func @attention_kernel(%arg0: i32, %arg1: memref<128x32xf32, #tpu.memory_space<vmem>>, %arg2: memref<32x16xbf16, #tpu.memory_space<vmem>>, %arg3: memref<2x16xf32, #tpu.memory_space<vmem>>, %arg4: memref<8x128xf32, #tpu.memory_space<vmem>>) attributes {dimension_semantics = [#tpu.dimension_semantics<parallel>], iteration_bounds = array<i64: 2>, scalar_prefetch = 0 : i64, scratch_operands = 0 : i64, tpu.core_type = #tpu.core_type<tc>, window_params = [{transform_indices = @transform_0, window_bounds = array<i64: 128, 32>}, {pipeline_mode = #tpu.pipeline_mode<synchronous>, transform_indices = @transform_1, window_bounds = array<i64: 32, 16>}, {pipeline_mode = #tpu.pipeline_mode<synchronous>, transform_indices = @transform_2, window_bounds = array<i64: 2, 16>}, {transform_indices = @transform_3, window_bounds = array<i64: 8, 128>}]} {
    %c0 = arith.constant 0 : index
    %c0_0 = arith.constant 0 : index
    %0 = vector.load %arg1[%c0, %c0_0] : memref<128x32xf32, #tpu.memory_space<vmem>>, vector<128x32xf32>
    %1 = arith.truncf %0 : vector<128x32xf32> to vector<128x32xbf16>
    %c0_1 = arith.constant 0 : index
    %c0_2 = arith.constant 0 : index
    %2 = vector.load %arg2[%c0_1, %c0_2] : memref<32x16xbf16, #tpu.memory_space<vmem>>, vector<32x16xbf16>
    %c0_3 = arith.constant 0 : index
    %c0_4 = arith.constant 0 : index
    %3 = vector.load %arg3[%c0_3, %c0_4] : memref<2x16xf32, #tpu.memory_space<vmem>>, vector<2x16xf32>
    %4 = vector.extract_strided_slice %3 {offsets = [0, 0], sizes = [1, 16], strides = [1, 1]} : vector<2x16xf32> to vector<1x16xf32>
    %5 = vector.extract_strided_slice %3 {offsets = [1, 0], sizes = [1, 16], strides = [1, 1]} : vector<2x16xf32> to vector<1x16xf32>
    %cst = arith.constant dense<0.000000e+00> : vector<128x16xf32>
    %6 = tpu.matmul %1, %2, %cst {dimension_numbers = #tpu.dot_dimension_numbers<[1], [0], [0], [1], [0, 0, 1, 1], [], []>} : vector<128x32xbf16>, vector<32x16xbf16>, vector<128x16xf32> -> vector<128x16xf32>
    %7 = vector.broadcast %4 : vector<1x16xf32> to vector<128x16xf32>
    %8 = arith.addf %6, %7 : vector<128x16xf32>
    %9 = math.tanh %8 : vector<128x16xf32>
    %10 = arith.truncf %5 : vector<1x16xf32> to vector<1x16xbf16>
    %11 = vector.shape_cast %10 : vector<1x16xbf16> to vector<1x16xbf16>
    %12 = vector.broadcast %11 : vector<1x16xbf16> to vector<8x16xbf16>
    %13 = arith.truncf %9 : vector<128x16xf32> to vector<128x16xbf16>
    %cst_5 = arith.constant dense<0.000000e+00> : vector<8x128xf32>
    %14 = tpu.matmul %12, %13, %cst_5 {dimension_numbers = #tpu.dot_dimension_numbers<[1], [1], [0], [0], [0, 0, 1, 0], [], []>} : vector<8x16xbf16>, vector<128x16xbf16>, vector<8x128xf32> -> vector<8x128xf32>
    %15 = tpu.iota {dimensions = array<i32: 1>} : vector<8x128xi32>
    %16 = tpu.iota {dimensions = array<i32: 0>} : vector<8x128xi32>
    %c16_i32 = arith.constant 16 : i32
    %17 = vector.broadcast %c16_i32 : i32 to vector<8x128xi32>
    %18 = arith.muli %16, %17 : vector<8x128xi32>
    %19 = arith.cmpi sge, %15, %18 : vector<8x128xi32>
    %c1_i32 = arith.constant 1 : i32
    %20 = vector.broadcast %c1_i32 : i32 to vector<8x128xi32>
    %21 = arith.addi %16, %20 : vector<8x128xi32>
    %c16_i32_6 = arith.constant 16 : i32
    %22 = vector.broadcast %c16_i32_6 : i32 to vector<8x128xi32>
    %23 = arith.muli %21, %22 : vector<8x128xi32>
    %24 = arith.cmpi slt, %15, %23 : vector<8x128xi32>
    %25 = arith.andi %19, %24 : vector<8x128xi1>
    %cst_7 = arith.constant -1.000000e+30 : f32
    %26 = vector.broadcast %cst_7 : f32 to vector<8x128xf32>
    %27 = arith.select %25, %14, %26 : vector<8x128xi1>, vector<8x128xf32>
    %cst_8 = arith.constant dense<0xFF800000> : vector<8xf32>
    %28 = vector.multi_reduction <maximumf>, %27, %cst_8 [1] : vector<8x128xf32> to vector<8xf32>
    %29 = vector.shape_cast %28 : vector<8xf32> to vector<8x1xf32>
    %30 = vector.broadcast %29 : vector<8x1xf32> to vector<8x128xf32>
    %31 = arith.subf %27, %30 : vector<8x128xf32>
    %32 = math.exp %31 : vector<8x128xf32>
    %cst_9 = arith.constant dense<0.000000e+00> : vector<8xf32>
    %33 = vector.multi_reduction <add>, %32, %cst_9 [1] : vector<8x128xf32> to vector<8xf32>
    %34 = vector.shape_cast %33 : vector<8xf32> to vector<8x1xf32>
    %35 = tpu.reciprocal %34 {approx = true} : vector<8x1xf32> -> vector<8x1xf32>
    %36 = vector.broadcast %35 : vector<8x1xf32> to vector<8x128xf32>
    %37 = arith.mulf %32, %36 : vector<8x128xf32>
    %38 = arith.truncf %37 : vector<8x128xf32> to vector<8x128xbf16>
    %cst_10 = arith.constant dense<0.000000e+00> : vector<8x32xf32>
    %39 = tpu.matmul %38, %1, %cst_10 {dimension_numbers = #tpu.dot_dimension_numbers<[1], [0], [0], [1], [0, 0, 1, 1], [], []>} : vector<8x128xbf16>, vector<128x32xbf16>, vector<8x32xf32> -> vector<8x32xf32>
    %cst_11 = arith.constant 0.000000e+00 : f32
    %40 = vector.broadcast %cst_11 : f32 to vector<8x96xf32>
    %41 = tpu.concatenate %39, %40 in 1 : vector<8x32xf32>, vector<8x96xf32> -> vector<8x128xf32>
    %c0_12 = arith.constant 0 : index
    %c0_13 = arith.constant 0 : index
    %42 = vector.load %arg4[%c0_12, %c0_13] : memref<8x128xf32, #tpu.memory_space<vmem>>, vector<8x128xf32>
    tpu.vector_store %arg4[%c0_12, %c0_13], %41 {strides = array<i32>} : memref<8x128xf32, #tpu.memory_space<vmem>>, vector<8x128xf32>,
    return
  }
  func.func @transform_0(%arg0: i32) -> (i32, i32) {
    %c0_i32 = arith.constant 0 : i32
    %c0_i32_0 = arith.constant 0 : i32
    return %arg0, %c0_i32 : i32, i32
  }
  func.func @transform_1(%arg0: i32) -> (i32, i32) {
    %c0_i32 = arith.constant 0 : i32
    %c0_i32_0 = arith.constant 0 : i32
    %c0_i32_1 = arith.constant 0 : i32
    return %c0_i32, %c0_i32_0 : i32, i32
  }
  func.func @transform_2(%arg0: i32) -> (i32, i32) {
    %c0_i32 = arith.constant 0 : i32
    %c0_i32_0 = arith.constant 0 : i32
    %c0_i32_1 = arith.constant 0 : i32
    return %c0_i32, %c0_i32_0 : i32, i32
  }
  func.func @transform_3(%arg0: i32) -> (i32, i32) {
    %c0_i32 = arith.constant 0 : i32
    %c0_i32_0 = arith.constant 0 : i32
    return %arg0, %c0_i32 : i32, i32
  }
}

</mosaic_0001>

<bundles_post_ra>
// kernel: tpu_custom_call.1
= control target key start
LH: loop header
LB: loop body
LE: loop exit
PB: predicated region body
PF: predicated region fallthrough
CT: control target
= control target key end

     0   :  { %8 = vsyncpa [#allocation3], 0  ;;  %s1063_s0 = inlined_call_operand.vmem [shape: f32[256,32], index: 0, kind: input, shape index: {}]   ;;  %s1064_s1 = inlined_call_operand.vmem [shape: bf16[32,16], index: 1, kind: input, shape index: {}]   ;;  %s1065_s2 = inlined_call_operand.vmem [shape: f32[2,16], index: 2, kind: input, shape index: {}]   ;;  %s1066_s3 = inlined_call_operand.hbm [shape: f32[16,128], index: 3, kind: output, shape index: {}]  }
   0x1   :  { %10 = vsyncpa [#allocation3 + $0x1], 0  ;;  %s850_s12 = smov 0   ;;  %s852_s13 = smov 0  }
   0x2   :  { %s854_s14 = smov 0   ;;  %s856_s15 = smov 0  }
   0x3 LB: > { %s871_s16 = sadd.s32 4294967295, %s825_s15   ;;  %s576_s17 = sadd.s32 4294967294, %s825_s15   ;;  %s825_s15 = sphi %s856_s15, %s1072_s15   ;;  %s821_s14 = sphi %s854_s14, %s1071_s14   ;;  %s817_s13 = sphi %s852_s13, %s1070_s13   ;;  %s813_s12 = sphi %s850_s12, %s1069_s12  }
   0x4   : > { %s875_s18 = sadd.s32 1, %s825_s15   ;;  %s91_s19 = sadd.s32 1, %s821_s14 }
   0x5   : > { %s88_s20 = ssub.s32 %s825_s15, %s875_s18  ;;  %p101_p0 = scmp.ne.s32.totalorder %s821_s14, %s817_s13 }
   0x6   : > { %p89_p1 = scmp.eq.s32.totalorder %s88_s20, 0  ;;  %p102_p2 = scmp.eq.s32.totalorder %s871_s16, 1 }
   0x7   : > { %p107_p3 = scmp.ne.s32.totalorder %s817_s13, %s813_s12  ;;  %p108_p4 = scmp.eq.s32.totalorder %s576_s17, 1 }
   0x8   : > { %s886_s21 = scalar_select %p89_p1, %s821_s14, %s91_s19  }
   0x9   : > { %p888_p5 = por %p102_p2, %p101_p0  ;;  %p892_p6 = por %p108_p4, %p107_p3 }
   0xa   : > { %p579_p7 = scmp.ge.s32.totalorder %s825_s15, 1  ;;  %p141_p8 = scmp.lt.s32.totalorder %s825_s15, 3 }
   0xc   : > { %p142_p9 = pnand %p579_p7, %p141_p8 }
   0xd   : > { %s581_s26 = sshll.u32 (!%p142_p9), %s871_s16, 4  ;;  %s162_s8 = sand.u32 (!%p142_p9), 1, %s817_s13  }
   0xe   : > { %145 = sbr.rel (%p142_p9) target bundleno = 1046 (0x416), region = 32  ;;  %p166_p10 = scmp.lt.s32.totalorder (!%p142_p9), %s581_s26, 31 }
   0xf   : > { %s580_s9 = sshll.u32 (!%p142_p9), %s162_s8, 3  ;;  %s595_s17 = sshll.u32 (!%p142_p9), %s871_s16, 7 }
  0x10   : > { %s164_s10 = scalar_lea.vmem (!%p142_p9), [#allocation2], %s580_s9  ;;  %s1021_s24 = scalar_lea.hbm (!%p142_p9), %s1066_s3, %s595_s17 }
  0x11   : > { %s517_s11 = sshll.u32 (!%p142_p9), %s164_s10, 4  ;;  %s504_s25 = scalar_lea.sflag (!%p142_p9), [#allocation3], %s162_s8  ;;  %s1023_s11 = int_to_ptr.vmem [resolvable:$true] %s517_s11 }
  0x12   : > { %s829_s16 = smov (!%p142_p9), [#allocation2]  }
  0x13   : > { %v727_v0 = vld [vmem:[%s1064_s1 + $0x8] sm:$0xff]   ;;  %v728_v1 = vld [vmem:[%s1064_s1] sm:$0xff]   ;;  %s1074_s26 = smov (!%p166_p10, %s581_s26), 31  ;;  %vm217_vm0 = vcmask 261120   ;;  %v827_v26 = vmov 0.0   ;;  %vm828_vm1 = vmmov 0   ;;  %v201_v27 = vlaneseq }
  0x14   : > { %626 = vmatprep.subr.bf16.mxu0 %v727_v0  ;;  %s582_s29 = sshll.u32 %s1074_s26, 3  ;;  %646 = vmatprep.subr.bf16.mxu1 %v827_v26  ;;  %v952_v30 = vld [vmem:[%s1065_s2] sm:$0x3]  ;;  %vm372_vm2 = vcmask 130048   ;;  %s765_s26 = scalar_lea.vmem %s1023_s11, 128 }
  0x15   : > { %627 = vmatpush3.bf16.msra.mxu0 %v727_v0  ;;  %s908_s5 = scalar_lea.vmem %s1063_s0, %s582_s29  ;;  %662 = vmatprep.mubr.msk.bf16.mxu1 %vm828_vm1, %v827_v26  ;;  %v946_v28 = vshrl.u32 %v201_v27, 7  ;;  %p766_p11 = scmp.ne.s32.totalorder %s1023_s11, %s765_s26 }
  0x16   : > { %628 = vmatprep.subr.bf16.mxu0 %v728_v1  ;;  %v172_v2 = vld [vmem:[%s908_s5] sm:$0xff]  ;;  %v173_v3 = vld [vmem:[%s908_s5 + $0x8] sm:$0xff]  ;;  %v174_v4 = vld [vmem:[%s908_s5 + $0x10] sm:$0xff]  ;;  %s769_s27 = sshll.u32 %s829_s16, 4  ;;  %s770_s27 = int_to_ptr.vmem [resolvable:$false] %s769_s27 }
  0x17   : > { %v188_v5 = vpack.c.bf16 %v173_v3, %v172_v2  ;;  %v175_v6 = vld [vmem:[%s908_s5 + $0x18] sm:$0xff]  ;;  %v176_v7 = vld [vmem:[%s908_s5 + $0x20] sm:$0xff]  ;;  %v177_v8 = vld [vmem:[%s908_s5 + $0x28] sm:$0xff]  ;;  %v203_v29 = vsub.s32 0, %v946_v28  ;;  %p767_p12 = pnand %p766_p11, %p888_p5  ;;  %s771_s28 = scalar_lea.vmem %s770_s27, 256 }
  0x18   : > { %v189_v9 = vpack.c.bf16 %v175_v6, %v174_v4  ;;  %v190_v10 = vpack.c.bf16 %v177_v8, %v176_v7  ;;  %v178_v11 = vld [vmem:[%s908_s5 + $0x30] sm:$0xff]  ;;  %v179_v12 = vld [vmem:[%s908_s5 + $0x38] sm:$0xff]  ;;  %v180_v13 = vld [vmem:[%s908_s5 + $0x40] sm:$0xff]  ;;  %p772_p0 = scmp.lt.s32.totalorder %s1023_s11, %s770_s27  ;;  %p773_p1 = scmp.lt.s32.totalorder %s771_s28, %s765_s26 }
  0x19   : > { %629 = vmatpush3.bf16.msra.mxu0 %v728_v1  ;;  %630 = vmatprep.mubr.msk.bf16.mxu0 %vm217_vm0, %v188_v5  ;;  %v181_v14 = vld [vmem:[%s908_s5 + $0x48] sm:$0xff]  ;;  %v191_v15 = vpack.c.bf16 %v179_v12, %v178_v11  ;;  %v182_v17 = vld [vmem:[%s908_s5 + $0x50] sm:$0xff]  ;;  %v183_v18 = vld [vmem:[%s908_s5 + $0x58] sm:$0xff]  ;;  %v957_v31 = vrot.slane %v952_v30, %v203_v29  ;;  %p768_p13 = pneg %p767_p12 }
  0x1a   : > { %v192_v16 = vpack.c.bf16 %v181_v14, %v180_v13  ;;  %v184_v19 = vld [vmem:[%s908_s5 + $0x60] sm:$0xff]  ;;  %v185_v20 = vld [vmem:[%s908_s5 + $0x68] sm:$0xff]  ;;  %v193_v21 = vpack.c.bf16 %v183_v18, %v182_v17  ;;  %v186_v23 = vld [vmem:[%s908_s5 + $0x70] sm:$0xff]  ;;  %666 = vmatprep.subr.bf16.mxu0 %v827_v26  ;;  %p774_p2 = por %p773_p1, %p772_p0 }
  0x1b   : > { %v194_v22 = vpack.c.bf16 %v185_v20, %v184_v19  ;;  %v187_v24 = vld [vmem:[%s908_s5 + $0x78] sm:$0xff] }
  0x1c   : > { %631 = vmatmul.mubr.msk.bf16.vlgmr.msra.gmra.mxu0 %vm217_vm0, %v189_v9  ;;  %v195_v25 = vpack.c.bf16 %v187_v24, %v186_v23  ;;  %p775_p3 = pnand %p774_p2, %p768_p13 }
  0x1d   : > { %634 = vmatprep.mubr.msk.bf16.mxu0 %vm217_vm0, %v190_v10 }
  0x1e   : > { %667 = vmatpush3.bf16.msra.mxu0 %v195_v25 }
  0x1f   : > { %668 = vmatprep.subr.bf16.mxu0 %v827_v26 }
  0x22   : > { %669 = vmatpush3.bf16.msra.mxu0 %v194_v22 }
  0x23   : > { %670 = vmatprep.subr.bf16.mxu0 %v827_v26 }
  0x24   : > { %635 = vmatmul.mubr.msk.bf16.gmra.mxu0 %vm217_vm0, %v191_v15 }
  0x25   : > { %638 = vmatprep.mubr.msk.bf16.mxu0 %vm217_vm0, %v192_v16 }
  0x26   : > { %671 = vmatpush3.bf16.msra.mxu0 %v193_v21 }
  0x27   : > { %672 = vmatprep.subr.bf16.mxu0 %v827_v26 }
  0x2a   : > { %673 = vmatpush3.bf16.msra.mxu0 %v192_v16 }
  0x2b   : > { %674 = vmatprep.subr.bf16.mxu0 %v827_v26 }
  0x2c   : > { %639 = vmatmul.mubr.msk.bf16.gmra.mxu0 %vm217_vm0, %v193_v21 }
  0x2d   : > { %642 = vmatprep.mubr.msk.bf16.mxu0 %vm217_vm0, %v194_v22 }
  0x2e   : > { %675 = vmatpush3.bf16.msra.mxu0 %v191_v15 }
  0x2f   : > { %676 = vmatprep.subr.bf16.mxu0 %v827_v26 }
  0x32   : > { %677 = vmatpush3.bf16.msra.mxu0 %v190_v10 }
  0x33   : > { %678 = vmatprep.subr.bf16.mxu0 %v827_v26 }
  0x34   : > { %643 = vmatmul.mubr.msk.bf16.gmra.mxu0 %vm217_vm0, %v195_v25 }
  0x35   : > { %682 = vmatprep.mubr.msk.bf16.mxu0 %vm828_vm1, %v827_v26 }
  0x36   : > { %679 = vmatpush3.bf16.msra.mxu0 %v189_v9 }
  0x37   : > { %680 = vmatprep.subr.bf16.mxu0 %v827_v26 }
  0x3a   : > { %681 = vmatpush3.bf16.msra.mxu0 %v188_v5 }
  0xdc   : > { %v632_v32 = vpop.f32.mrf.mxu0 }
  0xdd   : > { %v285_v33 = vadd.f32 %v632_v32, %v957_v31 }
  0xde   : > { %v276_v34 = vpop.f32.mrf.mxu0 }
  0xdf   : > { %v277_v35 = vadd.f32 %v276_v34, %v957_v31  ;;  %729 = vtanh.f32 %v285_v33 }
  0xe0   : > { %v633_v36 = vpop.f32.mrf.mxu0 }
  0xe1   : > { %v288_v37 = vadd.f32 %v633_v36, %v957_v31  ;;  %v355_v36 = vpack.c.bf16 %v952_v30, %v952_v30  ;;  %v441_v30 = vand.u32 127, %v201_v27 }
  0xe2   : > { %v279_v38 = vpop.f32.mrf.mxu0 }
  0xe3   : > { %731 = vtanh.f32 %v288_v37  ;;  %v280_v39 = vadd.f32 %v279_v38, %v957_v31  ;;  %v357_v37 = vshrl.u32 %v355_v36, 16 }
  0xe4   : > { %733 = vtanh.f32 %v277_v35  ;;  %v636_v40 = vpop.f32.mrf.mxu0 }
  0xe5   : > { %735 = vtanh.f32 %v280_v39  ;;  %v301_v12 = vadd.f32 %v636_v40, %v957_v31  ;;  %v358_v39 = vpack.i.b16 %v357_v37, %v357_v37 }
  0xe6   : > { %v292_v41 = vpop.f32.mrf.mxu0 }
  0xe7   : > { %v293_v18 = vadd.f32 %v292_v41, %v957_v31  ;;  %v363_v40 = vrot.slane %v358_v39, %v203_v29  ;;  %v446_v41 = vadd.s32 1, %v946_v28 }
  0xe8   : > { %v637_v42 = vpop.f32.mrf.mxu0 }
  0xe9   : > { %v304_v9 = vadd.f32 %v637_v42, %v957_v31  ;;  %v444_v42 = vmul.u32 16, %v946_v28 }
  0xea   : > { %v295_v43 = vpop.f32.mrf.mxu0 }
  0xeb   : > { %v296_v15 = vadd.f32 %v295_v43, %v957_v31  ;;  %vm445_vm3 = vcmp.ge.s32.totalorder %v441_v30, %v444_v42 }
  0xec   : > { %v640_v44 = vpop.f32.mrf.mxu0  ;;  %v963_v46 = vpop.eup %729 }
  0xed   : > { %v317_v63 = vadd.f32 %v640_v44, %v957_v31 }
  0xee   : > { %v308_v45 = vpop.f32.mrf.mxu0 }
  0xef   : > { %v309_v6 = vadd.f32 %v308_v45, %v957_v31 }
  0xf0   : > { %v965_v47 = vpop.eup %731  ;;  %v641_v48 = vpop.f32.mrf.mxu0 }
  0xf1   : > { %v967_v49 = vpop.eup %733  ;;  %v365_v50 = vpack.c.bf16 %v965_v47, %v963_v46  ;;  %v320_v62 = vadd.f32 %v641_v48, %v957_v31 }
  0xf2   : > { %v971_v51 = vpop.eup %735  ;;  %v311_v52 = vpop.f32.mrf.mxu0 }
  0xf3   : > { %v364_v53 = vpack.c.bf16 %v971_v51, %v967_v49  ;;  %v312_v3 = vadd.f32 %v311_v52, %v957_v31  ;;  %v380_v35 = vsel %vm372_vm2, %v365_v50, 0 }
  0xf4   : > { %v644_v54 = vpop.f32.mrf.mxu0 }
  0xf5   : > { %v333_v55 = vadd.f32 %v644_v54, %v957_v31  ;;  %v377_v38 = vsel %vm372_vm2, %v364_v53, 0 }
  0xf6   : > { %v324_v56 = vpop.f32.mrf.mxu0 }
  0xf7   : > { %737 = vtanh.f32 %v333_v55  ;;  %v325_v61 = vadd.f32 %v324_v56, %v957_v31 }
  0xf8   : > { %v645_v57 = vpop.f32.mrf.mxu0 }
  0xf9   : > { %v336_v58 = vadd.f32 %v645_v57, %v957_v31 }
  0xfa   : > { %v327_v59 = vpop.f32.mrf.mxu0 }
  0xfb   : > { %739 = vtanh.f32 %v336_v58  ;;  %v328_v60 = vadd.f32 %v327_v59, %v957_v31 }
  0xfd   : > { %741 = vtanh.f32 %v328_v60 }
  0xfe   : > { %743 = vtanh.f32 %v325_v61 }
  0xff   : > { %745 = vtanh.f32 %v320_v62 }
 0x100   : > { %747 = vtanh.f32 %v317_v63 }
 0x101   : > { %749 = vtanh.f32 %v312_v3 }
 0x102   : > { %751 = vtanh.f32 %v309_v6 }
 0x103   : > { %753 = vtanh.f32 %v304_v9 }
 0x104   : > { %v738_v0 = vpop.eup %737  ;;  %755 = vtanh.f32 %v301_v12 }
 0x105   : > { %757 = vtanh.f32 %v296_v15 }
 0x106   : > { %759 = vtanh.f32 %v293_v18 }
 0x108   : > { %v740_v1 = vpop.eup %739 }
 0x109   : > { %v371_v2 = vpack.c.bf16 %v740_v1, %v738_v0 }
 0x10a   : > { %v742_v5 = vpop.eup %741 }
 0x10b   : > { %v398_v4 = vsel %vm372_vm2, %v371_v2, 0  ;;  %v744_v7 = vpop.eup %743 }
 0x10c   : > { %647 = vmatpush3.bf16.xpose.msra.mxu1 %v398_v4  ;;  %v370_v8 = vpack.c.bf16 %v742_v5, %v744_v7  ;;  %v746_v11 = vpop.eup %745 }
 0x10d   : > { %648 = vmatprep.subr.bf16.mxu1 %v827_v26  ;;  %v748_v13 = vpop.eup %747 }
 0x10e   : > { %v395_v10 = vsel %vm372_vm2, %v370_v8, 0  ;;  %v369_v14 = vpack.c.bf16 %v746_v11, %v748_v13  ;;  %v750_v17 = vpop.eup %749 }
 0x10f   : > { %v752_v19 = vpop.eup %751 }
 0x110   : > { %v392_v16 = vsel %vm372_vm2, %v369_v14, 0  ;;  %v368_v20 = vpack.c.bf16 %v750_v17, %v752_v19  ;;  %v754_v22 = vpop.eup %753 }
 0x111   : > { %v756_v23 = vpop.eup %755 }
 0x112   : > { %v389_v21 = vsel %vm372_vm2, %v368_v20, 0  ;;  %v367_v24 = vpack.c.bf16 %v754_v22, %v756_v23  ;;  %v758_v32 = vpop.eup %757 }
 0x113   : > { %v760_v31 = vpop.eup %759 }
 0x114   : > { %649 = vmatpush3.bf16.xpose.msra.mxu1 %v395_v10  ;;  %v386_v25 = vsel %vm372_vm2, %v367_v24, 0  ;;  %v366_v33 = vpack.c.bf16 %v758_v32, %v760_v31 }
 0x115   : > { %650 = vmatprep.subr.bf16.mxu1 %v827_v26 }
 0x116   : > { %v383_v34 = vsel %vm372_vm2, %v366_v33, 0 }
 0x11c   : > { %651 = vmatpush3.bf16.xpose.msra.mxu1 %v392_v16 }
 0x11d   : > { %652 = vmatprep.subr.bf16.mxu1 %v827_v26 }
 0x124   : > { %653 = vmatpush3.bf16.xpose.msra.mxu1 %v389_v21 }
 0x125   : > { %654 = vmatprep.subr.bf16.mxu1 %v827_v26 }
 0x12c   : > { %655 = vmatpush3.bf16.xpose.msra.mxu1 %v386_v25 }
 0x12d   : > { %656 = vmatprep.subr.bf16.mxu1 %v827_v26 }
 0x134   : > { %657 = vmatpush3.bf16.xpose.msra.mxu1 %v383_v34 }
 0x135   : > { %658 = vmatprep.subr.bf16.mxu1 %v827_v26 }
 0x13c   : > { %659 = vmatpush3.bf16.xpose.msra.mxu1 %v380_v35 }
 0x13d   : > { %660 = vmatprep.subr.bf16.mxu1 %v827_v26  ;;  %v447_v26 = vmul.u32 16, %v446_v41 }
 0x13f   : > { %vm448_vm4 = vcmp.lt.s32.totalorder %v441_v30, %v447_v26 }
 0x140   : > { %vm449_vm5 = vmand %vm445_vm3, %vm448_vm4 }
 0x144   : > { %661 = vmatpush3.bf16.xpose.msra.mxu1 %v377_v38 }
 0x14b   : > { %663 = vmatmul.mubr.msk.bf16.vlgmr.msra.gmra.mxu1 %vm372_vm2, %v363_v40 }
 0x20b   : > { %v434_v43 = vpop.f32.mrf.mxu1 }
 0x20c   : > { %v450_v44 = vsel %vm449_vm5, %v434_v43, -1e+30 }
 0x20d   : > { %451 = vmax.xlane.f32.xlu0 %v450_v44  ;;  %v664_v45 = vpop.f32.mrf.mxu1 }
 0x20f   : > { %v437_v46 = vpop.f32.mrf.mxu1 }
 0x211   : > { %v665_v47 = vpop.f32.mrf.mxu1 }
 0x296   : > { %v452_v29 = vpop.xlane.xlu0 %451 }
 0x297   : > { %v453_v48 = vsub.f32 %v450_v44, %v452_v29 }
 0x299   : > { %v454_v49 = vmul.f32 1.442695, %v453_v48 }
 0x29b   : > { %761 = vpow2.f32 %v454_v49 }
 0x2a8   : > { %v762_v50 = vpop.eup %761 }
 0x2a9   : > { %456 = vadd.xlane.f32.xlu0 %v762_v50 }
 0x332   : > { %v457_v27 = vpop.xlane.xlu0 %456 }
 0x333   : > { %763 = vrcp.f32 %v457_v27 }
 0x340   : > { %v764_v28 = vpop.eup %763 }
 0x341   : > { %v459_v51 = vmul.f32 %v764_v28, %v762_v50 }
 0x343   : > { %v460_v52 = vpack.c.bf16 %v459_v51, %v459_v51 }
 0x345   : > { %683 = vmatmul.mubr.bf16.vlgmr.msra.gmra.mxu0 %v460_v52 }
 0x405   : > { %v495_v53 = vpop.f32.mrf.mxu0 }
 0x406   : > { %v501_v54 = vsel %vm217_vm0, %v495_v53, 0.0 }
 0x407   : > { %502 = vst [vmem:[%s164_s10] sm:$0xff] %v501_v54  ;;  %v684_v55 = vpop.f32.mrf.mxu0 }
 0x408   : > { %778 = shalt.err (!%p775_p3)
}
 0x409   : > { %s779_s29 = scalar_lea.hbm %s1021_s24, 128  ;;  %s783_s5 = scalar_lea.hbm %s1066_s3, 256 }
 0x40a   : > { %p780_p4 = scmp.ne.s32.totalorder %s1021_s24, %s779_s29  ;;  %p784_p9 = scmp.lt.s32.totalorder %s1021_s24, %s1066_s3 }
 0x40b   : > { %p785_p10 = scmp.lt.s32.totalorder %s783_s5, %s779_s29 }
 0x40c   : > { %p781_p7 = pnand %p780_p4, %p888_p5 }
 0x40d   : > { %p786_p11 = por %p785_p10, %p784_p9 }
 0x40e   : > { %p782_p8 = pneg %p781_p7 }
 0x410   : > { %p787_p12 = pnand %p786_p11, %p782_p8 }
 0x412   : > { %790 = shalt.err (!%p787_p12)
}
 0x413   : > { %686 = dma.vmem_to_hbm [thread:$0]  (%p888_p5), %s1023_s11, 128, %s1021_s24, %s504_s25   ;;  %v498_v56 = vpop.f32.mrf.mxu0 }
 0x415   : > { %v685_v57 = vpop.f32.mrf.mxu0 }
 0x416 PF: > { %p692_p13 = scmp.ge.s32.totalorder %s825_s15, 2  ;;  %s529_s8 = sand.u32 1, %s813_s12  }
 0x417   : > { %s530_s9 = scalar_lea.sflag [#allocation3], %s529_s8 }
 0x418   : > { %p689_p0 = pnand %p692_p13, %p892_p6 }
 0x41a   : > { %p690_p1 = pneg %p689_p0 }
 0x41c   : > { %808 = dma.done.wait (%p690_p1), %s530_s9, 128  }
 0x41d   : > { %810 = vsyncadd (%p690_p1), %s530_s9, 4294967168  ;;  %p13_p5 = scmp.ge.s32.totalorder %s875_s18, 4   ;;  %s1069_s12 = smov %s817_s13 }
 0x41e   : > { %s1070_s13 = smov %s821_s14  ;;  %s1071_s14 = smov %s886_s21 }
 0x41f   : > { %s1072_s15 = smov %s875_s18  ;;  %15 = sbr.rel (!%p13_p5) target bundleno = 3 (0x3), region = 67 }
 0x424   :  { %535 = vsyncpa [#allocation3], 1 }
 0x425   :  { %537 = vsyncpa [#allocation3 + $0x1], 1 }

</bundles_post_ra>
